<compile_context>
chip_gen: v7x
topology: tpu7x:2x2x1
jax: 0.10.0
libtpu: 0.0.40
codegen_flags: <defaults>
</compile_context>

<pallas_src>
import jax
import jax.numpy as jnp
from jax import lax
from jax.experimental import pallas as pl
from jax.experimental.pallas import tpu as pltpu


def _round_up(x, m):
    return ((x + m - 1) // m) * m


# --------------------------------------------------------------------------
# Small-matmul regime: pack TB batched matmuls into each grid step.
# --------------------------------------------------------------------------
def _bmm_batched_kernel(a_ref, b_ref, o_ref):
    # a_ref: (TB, m, k), b_ref: (TB, k, n_pad), o_ref: (TB, m, n_pad)
    acc = lax.dot_general(
        a_ref[...], b_ref[...],
        dimension_numbers=(((2,), (1,)), ((0,), (0,))),
        preferred_element_type=jnp.float32,   # f32 accumulation on the MXU
    )
    o_ref[...] = acc.astype(o_ref.dtype)


def _bmm_small(A3, B3, out_dtype):
    G, m, k = A3.shape
    _, _, n = B3.shape

    # Lane-dense output: pad N to a multiple of 128 so stores are unmasked.
    n_pad = _round_up(n, 128)
    if n_pad != n:
        B3 = jnp.pad(B3, ((0, 0), (0, 0), (0, n_pad - n)))

    itm_a = jnp.dtype(A3.dtype).itemsize
    itm_b = jnp.dtype(B3.dtype).itemsize
    itm_o = jnp.dtype(out_dtype).itemsize

    # Pick TB so one grid step's tiles total ~4 MiB (double-buffered by the
    # pipeline -> ~8 MiB peak, under the scoped-VMEM default everywhere).
    per_batch_bytes = m * k * itm_a + k * n_pad * itm_b + m * n_pad * itm_o
    TB = max(1, min(128, (4 * 1024 * 1024) // max(per_batch_bytes, 1)))
    TB = min(TB, G)
    G_pad = _round_up(G, TB)
    if G_pad != G:
        A3 = jnp.pad(A3, ((0, G_pad - G), (0, 0), (0, 0)))
        B3 = jnp.pad(B3, ((0, G_pad - G), (0, 0), (0, 0)))

    grid_spec = pltpu.PrefetchScalarGridSpec(
        num_scalar_prefetch=0,
        grid=(G_pad // TB,),
        in_specs=[
            pl.BlockSpec((TB, m, k), lambda i: (i, 0, 0)),
            pl.BlockSpec((TB, k, n_pad), lambda i: (i, 0, 0)),
        ],
        out_specs=pl.BlockSpec((TB, m, n_pad), lambda i: (i, 0, 0)),
    )

    out = pl.pallas_call(
        _bmm_batched_kernel,
        out_shape=jax.ShapeDtypeStruct((G_pad, m, n_pad), out_dtype),
        grid_spec=grid_spec,
        compiler_params=pltpu.CompilerParams(
            dimension_semantics=("parallel",),
        ),
        cost_estimate=pl.CostEstimate(
            flops=2 * G * m * n * k,
            transcendentals=0,
            bytes_accessed=G * (m * k * itm_a + k * n * itm_b + m * n * itm_o),
        ),
    )(A3, B3)
    return out[:G, :, :n]


# --------------------------------------------------------------------------
# Large-matmul regime: M/N/K tiling with a K-axis f32 accumulator in VMEM.
# --------------------------------------------------------------------------
def _mm_tiled_kernel(a_ref, b_ref, o_ref, acc_ref):
    # a_ref: (1, TM, TK), b_ref: (1, TK, TN), o_ref: (1, TM, TN)
    @pl.when(pl.program_id(3) == 0)
    def _zero():
        acc_ref[...] = jnp.zeros_like(acc_ref)

    acc_ref[...] += jnp.dot(a_ref[0], b_ref[0],
                            preferred_element_type=jnp.float32)

    @pl.when(pl.program_id(3) == pl.num_programs(3) - 1)
    def _store():
        o_ref[0] = acc_ref[...].astype(o_ref.dtype)


def _bmm_tiled(A3, B3, out_dtype):
    G, m, k = A3.shape
    _, _, n = B3.shape

    # MXU-aligned tiles; clamp to the (padded) problem size for small dims.
    TM = min(256, _round_up(m, 8))
    TN = min(256, _round_up(n, 128))
    TK = min(512, _round_up(k, 128))

    M = _round_up(m, TM)
    N = _round_up(n, TN)
    K = _round_up(k, TK)

    if (M, K) != (m, k):
        A3 = jnp.pad(A3, ((0, 0), (0, M - m), (0, K - k)))
    if (K, N) != (k, n):
        B3 = jnp.pad(B3, ((0, 0), (0, K - k), (0, N - n)))

    grid = (G, M // TM, N // TN, K // TK)

    grid_spec = pltpu.PrefetchScalarGridSpec(
        num_scalar_prefetch=0,
        grid=grid,
        in_specs=[
            pl.BlockSpec((1, TM, TK), lambda g, i, j, kk: (g, i, kk)),
            pl.BlockSpec((1, TK, TN), lambda g, i, j, kk: (g, kk, j)),
        ],
        out_specs=pl.BlockSpec((1, TM, TN), lambda g, i, j, kk: (g, i, j)),
        scratch_shapes=[pltpu.VMEM((TM, TN), jnp.float32)],
    )

    itm_a = jnp.dtype(A3.dtype).itemsize
    itm_b = jnp.dtype(B3.dtype).itemsize
    itm_o = jnp.dtype(out_dtype).itemsize

    out = pl.pallas_call(
        _mm_tiled_kernel,
        out_shape=jax.ShapeDtypeStruct((G, M, N), out_dtype),
        grid_spec=grid_spec,
        compiler_params=pltpu.CompilerParams(
            # K is the reduction axis: keep it last and 'arbitrary'.
            dimension_semantics=("parallel", "parallel", "parallel", "arbitrary"),
        ),
        cost_estimate=pl.CostEstimate(
            flops=2 * G * m * n * k,
            transcendentals=0,
            bytes_accessed=G * (m * k * itm_a + k * n * itm_b + m * n * itm_o),
        ),
    )(A3, B3)
    return out[:, :m, :n]


# --------------------------------------------------------------------------
# Public wrapper: forward of Approxmatmul_4D (exact 4-D batched matmul).
# --------------------------------------------------------------------------
def approx_matmul_4d(A, B, compute_dtype=None):
    """A: (b, c, m, k), B: (b, c, k, n) -> (b, c, m, n).

    compute_dtype: optionally cast inputs (e.g. jnp.bfloat16) at the kernel
    boundary; accumulation stays f32. Default None keeps exact f32 semantics.
    """
    b, c, m, k = A.shape
    b2, c2, k2, n = B.shape
    assert (b, c, k) == (b2, c2, k2), "incompatible shapes for 4-D matmul"

    out_dtype = jnp.result_type(A.dtype, B.dtype)
    if compute_dtype is not None:
        A = A.astype(compute_dtype)
        B = B.astype(compute_dtype)

    G = b * c
    A3 = A.reshape(G, m, k)
    B3 = B.reshape(G, k, n)

    if m <= 256 and n <= 256 and k <= 1024:
        out3 = _bmm_small(A3, B3, out_dtype)
    else:
        out3 = _bmm_tiled(A3, B3, out_dtype)

    return out3.reshape(b, c, m, n)


if __name__ == "__main__":
    key = jax.random.PRNGKey(0)
    ka, kb, kc, kd = jax.random.split(key, 4)

    # Small-matmul regime (typical attention-style per-head shapes).
    b, c, m, k, n = 2, 4, 16, 32, 16
    A = jax.random.normal(ka, (b, c, m, k), dtype=jnp.float32)
    B = jax.random.normal(kb, (b, c, k, n), dtype=jnp.float32)
    out = jax.block_until_ready(approx_matmul_4d(A, B))
    ref = jnp.einsum("bcmk,bckn->bcmn", A, B, precision=lax.Precision.HIGHEST)
    assert out.shape == (b, c, m, n)
    assert jnp.allclose(out, ref, atol=1e-5, rtol=1e-5)

    # Larger regime exercising the tiled M/N/K accumulator path.
    b2, c2, m2, k2, n2 = 1, 2, 384, 640, 320
    A2 = jax.random.normal(kc, (b2, c2, m2, k2), dtype=jnp.float32)
    B2 = jax.random.normal(kd, (b2, c2, k2, n2), dtype=jnp.float32)
    out2 = jax.block_until_ready(approx_matmul_4d(A2, B2))
    ref2 = jnp.einsum("bcmk,bckn->bcmn", A2, B2, precision=lax.Precision.HIGHEST)
    assert out2.shape == (b2, c2, m2, n2)
    assert jnp.allclose(out2, ref2, atol=1e-3, rtol=1e-4)

    print("KERNEL_OK")
</pallas_src>

<mosaic_0001>
module attributes {stable_mosaic.version = 11 : i64} {
  func.func @_bmm_batched_kernel(%arg0: i32, %arg1: memref<8x16x32xf32, #tpu.memory_space<vmem>>, %arg2: memref<8x32x128xf32, #tpu.memory_space<vmem>>, %arg3: memref<8x16x128xf32, #tpu.memory_space<vmem>>) attributes {dimension_semantics = [#tpu.dimension_semantics<parallel>], iteration_bounds = array<i64: 1>, scalar_prefetch = 0 : i64, scratch_operands = 0 : i64, tpu.core_type = #tpu.core_type<tc>, window_params = [{transform_indices = @transform_0, window_bounds = array<i64: 8, 16, 32>}, {transform_indices = @transform_1, window_bounds = array<i64: 8, 32, 128>}, {transform_indices = @transform_2, window_bounds = array<i64: 8, 16, 128>}]} {
    %c0 = arith.constant 0 : index
    %c0_0 = arith.constant 0 : index
    %c0_1 = arith.constant 0 : index
    %0 = vector.load %arg1[%c0, %c0_0, %c0_1] : memref<8x16x32xf32, #tpu.memory_space<vmem>>, vector<8x16x32xf32>
    %c0_2 = arith.constant 0 : index
    %c0_3 = arith.constant 0 : index
    %c0_4 = arith.constant 0 : index
    %1 = vector.load %arg2[%c0_2, %c0_3, %c0_4] : memref<8x32x128xf32, #tpu.memory_space<vmem>>, vector<8x32x128xf32>
    %cst = arith.constant dense<0.000000e+00> : vector<8x16x128xf32>
    %2 = tpu.matmul %0, %1, %cst {dimension_numbers = #tpu.dot_dimension_numbers<[2], [1], [1], [2], [0, 0, 0, 1, 1, 2], [0], [0]>} : vector<8x16x32xf32>, vector<8x32x128xf32>, vector<8x16x128xf32> -> vector<8x16x128xf32>
    %c0_5 = arith.constant 0 : index
    %c0_6 = arith.constant 0 : index
    %c0_7 = arith.constant 0 : index
    %3 = vector.load %arg3[%c0_5, %c0_6, %c0_7] : memref<8x16x128xf32, #tpu.memory_space<vmem>>, vector<8x16x128xf32>
    tpu.vector_store %arg3[%c0_5, %c0_6, %c0_7], %2 {strides = array<i32>} : memref<8x16x128xf32, #tpu.memory_space<vmem>>, vector<8x16x128xf32>,
    return
  }
  func.func @transform_0(%arg0: i32) -> (i32, i32, i32) {
    %c0_i32 = arith.constant 0 : i32
    %c0_i32_0 = arith.constant 0 : i32
    %c0_i32_1 = arith.constant 0 : i32
    return %arg0, %c0_i32, %c0_i32_0 : i32, i32, i32
  }
  func.func @transform_1(%arg0: i32) -> (i32, i32, i32) {
    %c0_i32 = arith.constant 0 : i32
    %c0_i32_0 = arith.constant 0 : i32
    %c0_i32_1 = arith.constant 0 : i32
    return %arg0, %c0_i32, %c0_i32_0 : i32, i32, i32
  }
  func.func @transform_2(%arg0: i32) -> (i32, i32, i32) {
    %c0_i32 = arith.constant 0 : i32
    %c0_i32_0 = arith.constant 0 : i32
    %c0_i32_1 = arith.constant 0 : i32
    return %arg0, %c0_i32, %c0_i32_0 : i32, i32, i32
  }
}

</mosaic_0001>

<bundles_post_ra>
// kernel: tpu_custom_call.1
= control target key start
LH: loop header
LB: loop body
LE: loop exit
PB: predicated region body
PF: predicated region fallthrough
CT: control target
= control target key end

     0   :  { %7 = vsyncpa [#allocation3], 0  ;;  %s1145_s0 = inlined_call_operand.hbm [shape: f32[8,16,32], index: 0, kind: input, shape index: {}]   ;;  %s1146_s1 = inlined_call_operand.hbm [shape: f32[8,32,128], index: 1, kind: input, shape index: {}]   ;;  %s1147_s2 = inlined_call_operand.hbm [shape: f32[8,16,128], index: 2, kind: output, shape index: {}]  }
   0x1   :  { %8 = vsyncpa [#allocation6], 0 }
   0x2   :  { %9 = vsyncpa [#allocation4], 0  ;;  %s1064_s9 = smov [#allocation2]   ;;  %s992_s13 = scalar_lea.hbm %s1145_s0, 2048 }
   0x3   :  { %s15_s10 = sshll.u32 %s1064_s9, 4  ;;  %p993_p0 = scmp.ne.s32.totalorder %s1145_s0, %s992_s13  ;;  %s16_s10 = int_to_ptr.vmem [resolvable:$true] %s15_s10 }
   0x4   :  { %p996_p1 = scmp.lt.u32.totalorder %s992_s13, %s1145_s0 }
   0x6   :  { %p998_p2 = pnand %p996_p1, %p993_p0 }
   0x8   :  { %1001 = shalt.err (!%p998_p2)
}
   0x9   :  { %s1002_s18 = scalar_lea.vmem %s16_s10, 2048  ;;  %p1007_p4 = scmp.lt.s32.totalorder %s16_s10, %s16_s10 }
   0xa   :  { %p1003_p3 = scmp.ne.s32.totalorder %s16_s10, %s1002_s18  ;;  %p1008_p5 = scmp.lt.s32.totalorder %s1002_s18, %s1002_s18 }
   0xc   :  { %p1009_p6 = por %p1008_p5, %p1007_p4 }
   0xe   :  { %p1010_p7 = pnand %p1009_p6, %p1003_p3 }
  0x10   :  { %1013 = shalt.err (!%p1010_p7)
}
  0x11   :  { %s1065_s19 = smov 128   ;;  %s1066_s20 = smov 8  }
  0x12   :  { %21 = dma.hbm_to_vmem [thread:$0]  %s1145_s0, 2048, %s16_s10, [#allocation3], %s1065_s19, %s1065_s19, %s1066_s20  }
  0x13   :  { %s1067_s23 = smov [#allocation5]   ;;  %s1014_s27 = scalar_lea.hbm %s1146_s1, 4096 }
  0x14   :  { %s27_s24 = sshll.u32 %s1067_s23, 4  ;;  %p1015_p8 = scmp.ne.s32.totalorder %s1146_s1, %s1014_s27  ;;  %s28_s24 = int_to_ptr.vmem [resolvable:$true] %s27_s24 }
  0x15   :  { %p1018_p9 = scmp.lt.u32.totalorder %s1014_s27, %s1146_s1 }
  0x17   :  { %p1020_p10 = pnand %p1018_p9, %p1015_p8 }
  0x19   :  { %1023 = shalt.err (!%p1020_p10)
}
  0x1a   :  { %s1024_s4 = scalar_lea.vmem %s28_s24, 4096  ;;  %p1029_p12 = scmp.lt.s32.totalorder %s28_s24, %s28_s24 }
  0x1b   :  { %p1025_p11 = scmp.ne.s32.totalorder %s28_s24, %s1024_s4  ;;  %p1030_p13 = scmp.lt.s32.totalorder %s1024_s4, %s1024_s4 }
  0x1d   :  { %p1031_p0 = por %p1030_p13, %p1029_p12 }
  0x1f   :  { %p1032_p1 = pnand %p1031_p0, %p1025_p11 }
  0x21   :  { %1035 = shalt.err (!%p1032_p1)
}
  0x22   :  { %33 = dma.hbm_to_vmem [thread:$0]  %s1146_s1, 4096, %s28_s24, [#allocation6], %s1065_s19, %s1065_s19, %s1066_s20  }
  0x23   :  { %1058 = dma.done.wait [#allocation3], 2048  }
  0x24   :  { %1059 = vsyncadd [#allocation3], 4294965248 }
  0x25   :  { %1060 = dma.done.wait [#allocation6], 4096  }
  0x26   :  { %1061 = vsyncadd [#allocation6], 4294963200  ;;  %v56_v0 = vld [vmem:[#allocation5] sm:$0xff]  ;;  %v57_v1 = vld [vmem:[#allocation5 + $0x8] sm:$0xff]  ;;  %vm88_vm0 = vcmask 261120   ;;  %s1068_s1 = smov [#allocation7]  }
  0x27   :  { %v60_v2 = vld [vmem:[#allocation5 + $0x20] sm:$0xff]  ;;  %v923_v3 = vpack.c.bf16 %v57_v1, %v56_v0  ;;  %v61_v4 = vld [vmem:[#allocation5 + $0x28] sm:$0xff]  ;;  %v58_v5 = vld [vmem:[#allocation5 + $0x10] sm:$0xff]  ;;  %s758_s6 = sshll.u32 %s1068_s1, 4  ;;  %s759_s6 = int_to_ptr.vmem [resolvable:$true] %s758_s6 }
  0x28   :  { %v59_v6 = vld [vmem:[#allocation5 + $0x18] sm:$0xff]  ;;  %v931_v7 = vpack.c.bf16 %v61_v4, %v60_v2  ;;  %v62_v9 = vld [vmem:[#allocation5 + $0x30] sm:$0xff]  ;;  %v40_v11 = vld [vmem:[#allocation2] sm:$0xff]  ;;  %s1036_s7 = scalar_lea.vmem %s759_s6, 2048  ;;  %p1041_p3 = scmp.lt.s32.totalorder %s759_s6, %s759_s6 }
  0x29   :  { %v927_v8 = vpack.c.bf16 %v59_v6, %v58_v5  ;;  %v63_v10 = vld [vmem:[#allocation5 + $0x38] sm:$0xff]  ;;  %924 = vmatprep.subr.bf16.mxu0 %v923_v3  ;;  %843 = vmatprep.mubr.msk.f32.mxu0 %vm88_vm0, %v40_v11  ;;  %v42_v13 = vld [vmem:[#allocation2 + $0x10] sm:$0xff]  ;;  %v64_v14 = vld [vmem:[#allocation5 + $0x40] sm:$0xff]  ;;  %p1037_p2 = scmp.ne.s32.totalorder %s759_s6, %s1036_s7  ;;  %p1042_p4 = scmp.lt.s32.totalorder %s1036_s7, %s1036_s7 }
  0x2a   :  { %v935_v12 = vpack.c.bf16 %v63_v10, %v62_v9  ;;  %932 = vmatprep.subr.bf16.mxu1 %v931_v7  ;;  %926 = vmatpush3.bf16.msra.mxu0 %v923_v3  ;;  %v65_v15 = vld [vmem:[#allocation5 + $0x48] sm:$0xff]  ;;  %v68_v16 = vld [vmem:[#allocation5 + $0x60] sm:$0xff]  ;;  %v66_v20 = vld [vmem:[#allocation5 + $0x50] sm:$0xff] }
  0x2b   :  { %934 = vmatpush3.bf16.msra.mxu1 %v931_v7  ;;  %928 = vmatprep.subr.bf16.mxu0 %v927_v8  ;;  %v939_v17 = vpack.c.bf16 %v65_v15, %v64_v14  ;;  %v69_v18 = vld [vmem:[#allocation5 + $0x68] sm:$0xff]  ;;  %v67_v21 = vld [vmem:[#allocation5 + $0x58] sm:$0xff]  ;;  %v70_v22 = vld [vmem:[#allocation5 + $0x70] sm:$0xff]  ;;  %p1043_p5 = por %p1042_p4, %p1041_p3 }
  0x2c   :  { %936 = vmatprep.subr.bf16.mxu1 %v935_v12  ;;  %854 = vmatprep.mubr.msk.f32.mxu1 %vm88_vm0, %v42_v13  ;;  %v947_v19 = vpack.c.bf16 %v69_v18, %v68_v16  ;;  %v71_v23 = vld [vmem:[#allocation5 + $0x78] sm:$0xff]  ;;  %v41_v24 = vld [vmem:[#allocation2 + $0x8] sm:$0xff]  ;;  %v943_v26 = vpack.c.bf16 %v67_v21, %v66_v20  ;;  %v72_v28 = vld [vmem:[#allocation5 + $0x80] sm:$0xff] }
  0x2d   :  { %v43_v25 = vld [vmem:[#allocation2 + $0x18] sm:$0xff]  ;;  %v951_v27 = vpack.c.bf16 %v71_v23, %v70_v22  ;;  %v73_v29 = vld [vmem:[#allocation5 + $0x88] sm:$0xff]  ;;  %v44_v30 = vld [vmem:[#allocation2 + $0x20] sm:$0xff]  ;;  %p1044_p6 = pnand %p1043_p5, %p1037_p2 }
  0x2e   :  { %930 = vmatpush3.bf16.msra.mxu0 %v927_v8  ;;  %v76_v31 = vld [vmem:[#allocation5 + $0xa0] sm:$0xff]  ;;  %v77_v32 = vld [vmem:[#allocation5 + $0xa8] sm:$0xff]  ;;  %v46_v33 = vld [vmem:[#allocation2 + $0x30] sm:$0xff]  ;;  %v955_v34 = vpack.c.bf16 %v73_v29, %v72_v28 }
  0x2f   :  { %938 = vmatpush3.bf16.msra.mxu1 %v935_v12  ;;  %940 = vmatprep.subr.bf16.mxu0 %v939_v17  ;;  %v963_v35 = vpack.c.bf16 %v77_v32, %v76_v31  ;;  %v74_v36 = vld [vmem:[#allocation5 + $0x90] sm:$0xff]  ;;  %v75_v37 = vld [vmem:[#allocation5 + $0x98] sm:$0xff]  ;;  %v45_v40 = vld [vmem:[#allocation2 + $0x28] sm:$0xff] }
  0x30   :  { %948 = vmatprep.subr.bf16.mxu1 %v947_v19  ;;  %v78_v38 = vld [vmem:[#allocation5 + $0xb0] sm:$0xff]  ;;  %v79_v39 = vld [vmem:[#allocation5 + $0xb8] sm:$0xff]  ;;  %v959_v42 = vpack.c.bf16 %v75_v37, %v74_v36  ;;  %v80_v44 = vld [vmem:[#allocation5 + $0xc0] sm:$0xff] }
  0x31   :  { %844 = vmatmul.mubr.msk.f32.vlgmr.msra.gmra.mrb[0].mxu0 %vm88_vm0, %v41_v24  ;;  %v47_v41 = vld [vmem:[#allocation2 + $0x38] sm:$0xff]  ;;  %v967_v43 = vpack.c.bf16 %v79_v39, %v78_v38  ;;  %v81_v45 = vld [vmem:[#allocation5 + $0xc8] sm:$0xff]  ;;  %v48_v46 = vld [vmem:[#allocation2 + $0x40] sm:$0xff] }
  0x32   :  { %855 = vmatmul.mubr.msk.f32.vlgmr.msra.gmra.mrb[0].mxu1 %vm88_vm0, %v43_v25  ;;  %942 = vmatpush3.bf16.msra.mxu0 %v939_v17  ;;  %v84_v47 = vld [vmem:[#allocation5 + $0xe0] sm:$0xff]  ;;  %v85_v48 = vld [vmem:[#allocation5 + $0xe8] sm:$0xff]  ;;  %v50_v49 = vld [vmem:[#allocation2 + $0x50] sm:$0xff]  ;;  %v971_v50 = vpack.c.bf16 %v81_v45, %v80_v44 }
  0x33   :  { %950 = vmatpush3.bf16.msra.mxu1 %v947_v19  ;;  %944 = vmatprep.subr.bf16.mxu0 %v943_v26  ;;  %v979_v51 = vpack.c.bf16 %v85_v48, %v84_v47  ;;  %v82_v52 = vld [vmem:[#allocation5 + $0xd0] sm:$0xff]  ;;  %v83_v53 = vld [vmem:[#allocation5 + $0xd8] sm:$0xff]  ;;  %v49_v56 = vld [vmem:[#allocation2 + $0x48] sm:$0xff] }
  0x34   :  { %952 = vmatprep.subr.bf16.mxu1 %v951_v27  ;;  %865 = vmatprep.mubr.msk.f32.mxu0 %vm88_vm0, %v44_v30  ;;  %v86_v54 = vld [vmem:[#allocation5 + $0xf0] sm:$0xff]  ;;  %v87_v55 = vld [vmem:[#allocation5 + $0xf8] sm:$0xff]  ;;  %v975_v58 = vpack.c.bf16 %v83_v53, %v82_v52  ;;  %v52_v60 = vld [vmem:[#allocation2 + $0x60] sm:$0xff] }
  0x35   :  { %876 = vmatprep.mubr.msk.f32.mxu1 %vm88_vm0, %v46_v33  ;;  %v51_v57 = vld [vmem:[#allocation2 + $0x58] sm:$0xff]  ;;  %v983_v59 = vpack.c.bf16 %v87_v55, %v86_v54  ;;  %v54_v61 = vld [vmem:[#allocation2 + $0x70] sm:$0xff]  ;;  %v53_v62 = vld [vmem:[#allocation2 + $0x68] sm:$0xff] }
  0x36   :  { %946 = vmatpush3.bf16.msra.mxu0 %v943_v26  ;;  %v55_v63 = vld [vmem:[#allocation2 + $0x78] sm:$0xff] }
  0x37   :  { %954 = vmatpush3.bf16.msra.mxu1 %v951_v27  ;;  %956 = vmatprep.subr.bf16.mxu0 %v955_v34 }
  0x38   :  { %964 = vmatprep.subr.bf16.mxu1 %v963_v35 }
  0x39   :  { %866 = vmatmul.mubr.msk.f32.vlgmr.msra.gmra.mrb[2].mxu0 %vm88_vm0, %v45_v40 }
  0x3a   :  { %877 = vmatmul.mubr.msk.f32.vlgmr.msra.gmra.mrb[2].mxu1 %vm88_vm0, %v47_v41  ;;  %958 = vmatpush3.bf16.msra.mxu0 %v955_v34 }
  0x3b   :  { %966 = vmatpush3.bf16.msra.mxu1 %v963_v35  ;;  %960 = vmatprep.subr.bf16.mxu0 %v959_v42 }
  0x3c   :  { %968 = vmatprep.subr.bf16.mxu1 %v967_v43  ;;  %887 = vmatprep.mubr.msk.f32.mxu0 %vm88_vm0, %v48_v46 }
  0x3d   :  { %898 = vmatprep.mubr.msk.f32.mxu1 %vm88_vm0, %v50_v49 }
  0x3e   :  { %962 = vmatpush3.bf16.msra.mxu0 %v959_v42 }
  0x3f   :  { %970 = vmatpush3.bf16.msra.mxu1 %v967_v43  ;;  %972 = vmatprep.subr.bf16.mxu0 %v971_v50 }
  0x40   :  { %980 = vmatprep.subr.bf16.mxu1 %v979_v51 }
  0x41   :  { %888 = vmatmul.mubr.msk.f32.vlgmr.msra.gmra.mrb[4].mxu0 %vm88_vm0, %v49_v56 }
  0x42   :  { %899 = vmatmul.mubr.msk.f32.vlgmr.msra.gmra.mrb[4].mxu1 %vm88_vm0, %v51_v57  ;;  %974 = vmatpush3.bf16.msra.mxu0 %v971_v50 }
  0x43   :  { %982 = vmatpush3.bf16.msra.mxu1 %v979_v51  ;;  %976 = vmatprep.subr.bf16.mxu0 %v975_v58 }
  0x44   :  { %984 = vmatprep.subr.bf16.mxu1 %v983_v59  ;;  %909 = vmatprep.mubr.msk.f32.mxu0 %vm88_vm0, %v52_v60 }
  0x45   :  { %920 = vmatprep.mubr.msk.f32.mxu1 %vm88_vm0, %v54_v61 }
  0x46   :  { %978 = vmatpush3.bf16.msra.mxu0 %v975_v58 }
  0x47   :  { %986 = vmatpush3.bf16.msra.mxu1 %v983_v59 }
  0x49   :  { %910 = vmatmul.mubr.msk.f32.vlgmr.msra.gmra.mrb[6].mxu0 %vm88_vm0, %v53_v62 }
  0x4a   :  { %921 = vmatmul.mubr.msk.f32.vlgmr.msra.gmra.mrb[6].mxu1 %vm88_vm0, %v55_v63 }
 0x104   :  { %v845_v0 = vpop.f32.mrb[0].mxu0 }
 0x105   :  { %738 = vst [vmem:[#allocation7 + $0x8] sm:$0xff] %v845_v0  ;;  %v856_v1 = vpop.f32.mrb[0].mxu1  ;;  %v161_v2 = vpop.f32.mrb[1].mxu0 }
 0x106   :  { %740 = vst [vmem:[#allocation7 + $0x18] sm:$0xff] %v856_v1  ;;  %737 = vst [vmem:[#allocation7] sm:$0xff] %v161_v2  ;;  %v242_v3 = vpop.f32.mrb[1].mxu1 }
 0x107   :  { %739 = vst [vmem:[#allocation7 + $0x10] sm:$0xff] %v242_v3 }
 0x10c   :  { %v867_v4 = vpop.f32.mrb[2].mxu0 }
 0x10d   :  { %742 = vst [vmem:[#allocation7 + $0x28] sm:$0xff] %v867_v4  ;;  %v878_v5 = vpop.f32.mrb[2].mxu1  ;;  %v323_v6 = vpop.f32.mrb[3].mxu0 }
 0x10e   :  { %744 = vst [vmem:[#allocation7 + $0x38] sm:$0xff] %v878_v5  ;;  %741 = vst [vmem:[#allocation7 + $0x20] sm:$0xff] %v323_v6  ;;  %v404_v7 = vpop.f32.mrb[3].mxu1 }
 0x10f   :  { %743 = vst [vmem:[#allocation7 + $0x30] sm:$0xff] %v404_v7 }
 0x114   :  { %v889_v8 = vpop.f32.mrb[4].mxu0 }
 0x115   :  { %746 = vst [vmem:[#allocation7 + $0x48] sm:$0xff] %v889_v8  ;;  %v900_v9 = vpop.f32.mrb[4].mxu1  ;;  %v485_v10 = vpop.f32.mrb[5].mxu0 }
 0x116   :  { %748 = vst [vmem:[#allocation7 + $0x58] sm:$0xff] %v900_v9  ;;  %745 = vst [vmem:[#allocation7 + $0x40] sm:$0xff] %v485_v10  ;;  %v566_v11 = vpop.f32.mrb[5].mxu1 }
 0x117   :  { %747 = vst [vmem:[#allocation7 + $0x50] sm:$0xff] %v566_v11 }
 0x11c   :  { %v911_v12 = vpop.f32.mrb[6].mxu0 }
 0x11d   :  { %750 = vst [vmem:[#allocation7 + $0x68] sm:$0xff] %v911_v12  ;;  %v922_v13 = vpop.f32.mrb[6].mxu1  ;;  %v647_v14 = vpop.f32.mrb[7].mxu0 }
 0x11e   :  { %752 = vst [vmem:[#allocation7 + $0x78] sm:$0xff] %v922_v13  ;;  %749 = vst [vmem:[#allocation7 + $0x60] sm:$0xff] %v647_v14  ;;  %v728_v15 = vpop.f32.mrb[7].mxu1 }
 0x11f   :  { %751 = vst [vmem:[#allocation7 + $0x70] sm:$0xff] %v728_v15 }
 0x120   :  { %1047 = shalt.err (!%p1044_p6)
}
 0x121   :  { %s1048_s10 = scalar_lea.hbm %s1147_s2, 2048 }
 0x122   :  { %p1049_p7 = scmp.ne.s32.totalorder %s1147_s2, %s1048_s10  ;;  %p1052_p8 = scmp.lt.u32.totalorder %s1048_s10, %s1147_s2 }
 0x124   :  { %p1054_p9 = pnand %p1052_p8, %p1049_p7 }
 0x126   :  { %1057 = shalt.err (!%p1054_p9)
}
 0x127   :  { %764 = dma.vmem_to_hbm [thread:$0]  %s759_s6, 2048, %s1147_s2, [#allocation4], %s1065_s19, %s1065_s19, %s1066_s20  }
 0x128   :  { %1062 = dma.done.wait [#allocation4], 2048  }
 0x129   :  { %1063 = vsyncadd [#allocation4], 4294965248 }
 0x12a   :  { %768 = vsyncpa [#allocation3], 1 }
 0x12b   :  { %769 = vsyncpa [#allocation6], 1 }
 0x12c   :  { %770 = vsyncpa [#allocation4], 1 }

</bundles_post_ra>
